<compile_context>
chip_gen: v7x
topology: tpu7x:2x2x1
jax: 0.10.0
libtpu: 0.0.40
codegen_flags: <defaults>
</compile_context>

<pallas_src>
import functools

import jax
import jax.numpy as jnp
from jax.experimental import pallas as pl
from jax.experimental.pallas import tpu as pltpu


def _src_embed_kernel(x_ref, w_ref, p_ref, o_ref, *, eps, mxu_dtype):
    # ---- Linear: (tile_m, K) @ (K, N) on the MXU, f32 accumulation. -------
    x = x_ref[...]
    w = w_ref[...]
    if mxu_dtype is not None:
        x = x.astype(mxu_dtype)       # bf16 operands (MXU-native on v5e/v6e/v7x)
        w = w.astype(mxu_dtype)
    y = jnp.dot(x, w, preferred_element_type=jnp.float32)

    # Packed LayerNorm params: row 0 = linear bias, row 1 = gamma, row 2 = beta.
    p = p_ref[...].astype(jnp.float32)
    y = y + p[0:1, :]

    # ---- LayerNorm exactly as in the PyTorch module (all math in f32). ----
    d = y.shape[-1]
    mean = jnp.mean(y, axis=-1, keepdims=True)
    centered = y - mean
    var = jnp.sum(centered * centered, axis=-1, keepdims=True) / (d - 1.0)
    std = jnp.sqrt(var)

    # Per-row reciprocal on the EUP (free slot) + one Newton step so numerics
    # stay at f32 accuracy; the remaining work is one cheap VPU multiply
    # instead of a full (tile_m, d_model) divide.
    denom = std + eps
    inv = pl.reciprocal(denom, approx=True)
    inv = inv * (2.0 - denom * inv)

    out = p[1:2, :] * (centered * inv) + p[2:3, :]
    o_ref[...] = out.astype(o_ref.dtype)


def _round_up(n, m):
    return ((n + m - 1) // m) * m


def _default_vmem_limit_bytes():
    # Leave headroom below physical VMEM (128 MiB v5e/v6e, 64 MiB v7x).
    try:
        cap = pltpu.get_tpu_info().vmem_capacity_bytes
        return int(cap * 3 // 4)
    except Exception:
        return 48 * 1024 * 1024


def src_embed(x, w, b, gamma, beta, *, eps=1e-6, tile_m=512,
              use_bf16_mxu=True, vmem_limit_bytes=None):
    """x: (..., input_dim); w: (input_dim, d_model); b/gamma/beta: (d_model,).

    For best perf pass w (and optionally x) already stored as bf16: the kernel
    multiplies in bf16 either way but pre-stored bf16 also halves the HBM read
    and the weight's VMEM footprint.
    """
    input_dim = x.shape[-1]
    d_model = w.shape[-1]
    lead = x.shape[:-1]

    x2d = x.reshape(-1, input_dim)
    M = x2d.shape[0]

    # Large row tile for MXU occupancy / HBM roofline, clamped to M, multiple
    # of 8 (sublane constraint) ...
    tile_m = max(8, min(tile_m, _round_up(M, 8)))
    # ... and capped so the grid has >= 2 steps whenever M > 8, so the
    # "parallel" axis can shard across v7x's two TensorCores.
    tile_m = min(tile_m, max(8, _round_up(pl.cdiv(M, 2), 8)))

    grid = (pl.cdiv(M, tile_m),)

    if vmem_limit_bytes is None:
        vmem_limit_bytes = _default_vmem_limit_bytes()

    mxu_dtype = jnp.bfloat16 if use_bf16_mxu else None
    kernel = functools.partial(_src_embed_kernel, eps=float(eps),
                               mxu_dtype=mxu_dtype)

    # Pack bias / gamma / beta into one lane-dense (3, d_model) operand.
    params = jnp.stack([b.reshape(-1), gamma.reshape(-1),
                        beta.reshape(-1)]).astype(jnp.float32)

    def _run(single_buffer_consts):
        const_kw = ({"pipeline_mode": pl.Buffered(1)}
                    if single_buffer_consts else {})
        in_specs = [
            # Row tile of activations (ragged last block handled by Pallas).
            pl.BlockSpec((tile_m, input_dim), lambda i: (i, 0)),
            # Weight: whole array, constant block index -> VMEM resident,
            # fetched once; single-buffered (no benefit from 2 buffers).
            pl.BlockSpec((input_dim, d_model), lambda i: (0, 0), **const_kw),
            # Packed bias/gamma/beta, same treatment.
            pl.BlockSpec((3, d_model), lambda i: (0, 0), **const_kw),
        ]
        out_specs = pl.BlockSpec((tile_m, d_model), lambda i: (i, 0))
        return pl.pallas_call(
            kernel,
            out_shape=jax.ShapeDtypeStruct((M, d_model), x.dtype),
            grid_spec=pltpu.PrefetchScalarGridSpec(
                num_scalar_prefetch=0,
                grid=grid,
                in_specs=in_specs,
                out_specs=out_specs,
            ),
            compiler_params=pltpu.CompilerParams(
                dimension_semantics=("parallel",),
                vmem_limit_bytes=vmem_limit_bytes,
            ),
        )(x2d, w, params)

    try:
        out2d = _run(True)
    except Exception:
        # Fallback if this jax build rejects pipeline_mode / Buffered(1);
        # only cost is one extra (unused) VMEM buffer per constant operand.
        out2d = _run(False)

    return out2d.reshape(*lead, d_model)


def _reference(x, w, b, gamma, beta, eps, mxu_dtype, precision=None):
    """Pure-JAX reference with torch semantics (unbiased std, std + eps)."""
    d_model = w.shape[-1]
    x2d = x.reshape(-1, x.shape[-1])
    if mxu_dtype is not None:
        x2d, w = x2d.astype(mxu_dtype), w.astype(mxu_dtype)
    y = jnp.dot(x2d, w, preferred_element_type=jnp.float32,
                precision=precision) + b.astype(jnp.float32)
    mean = jnp.mean(y, axis=-1, keepdims=True)
    cen = y - mean
    std = jnp.sqrt(jnp.sum(cen * cen, axis=-1, keepdims=True) / (d_model - 1.0))
    out = gamma.astype(jnp.float32) * cen / (std + eps) + beta.astype(jnp.float32)
    return out.reshape(*x.shape[:-1], d_model).astype(x.dtype)


if __name__ == "__main__":
    input_dim, d_model, eps = 128, 128, 1e-6

    key = jax.random.PRNGKey(0)
    kx, kw, kb, kg, kbe, kx2 = jax.random.split(key, 6)

    # nn.Linear-like uniform init; LayerNorm params perturbed from ones/zeros
    # so the affine part is actually exercised.
    lim = 1.0 / (input_dim ** 0.5)
    w_f32 = jax.random.uniform(kw, (input_dim, d_model), jnp.float32, -lim, lim)
    b = jax.random.uniform(kb, (d_model,), jnp.float32, -lim, lim)
    gamma = 1.0 + 0.1 * jax.random.normal(kg, (d_model,), jnp.float32)
    beta = 0.1 * jax.random.normal(kbe, (d_model,), jnp.float32)

    # Weight stored/passed as bf16 (halves its HBM read + VMEM footprint);
    # accumulation inside the kernel stays f32.
    w = w_f32.astype(jnp.bfloat16)

    cases = {
        "even  M=16": jax.random.normal(kx, (2, 8, input_dim), jnp.float32),
        "ragged M=15": jax.random.normal(kx2, (3, 5, input_dim), jnp.float32),
    }

    for name, x in cases.items():
        out = jax.block_until_ready(src_embed(x, w, b, gamma, beta, eps=eps))
        assert out.shape == x.shape[:-1] + (d_model,), (name, out.shape)

        # Tight check vs a reference with matching bf16 MXU products.
        ref = _reference(x, w, b, gamma, beta, eps, jnp.bfloat16)
        err = float(jnp.max(jnp.abs(out - ref)))
        assert jnp.allclose(out, ref, atol=1e-3, rtol=1e-3), (name, err)

        # Loose sanity check vs a full-f32 (torch-like) linear: the only
        # divergence is the deliberate bf16 MXU operand choice.
        ref32 = _reference(x, w_f32, b, gamma, beta, eps, None,
                           precision=jax.lax.Precision.HIGHEST)
        err32 = float(jnp.max(jnp.abs(out - ref32)))
        assert err32 < 3e-2, (name, err32)

    print("KERNEL_OK")
</pallas_src>

<mosaic_0001>
module attributes {stable_mosaic.version = 11 : i64} {
  func.func @_src_embed_kernel(%arg0: i32, %arg1: memref<8x128xf32, #tpu.memory_space<vmem>>, %arg2: memref<128x128xbf16, #tpu.memory_space<vmem>>, %arg3: memref<3x128xf32, #tpu.memory_space<vmem>>, %arg4: memref<8x128xf32, #tpu.memory_space<vmem>>) attributes {dimension_semantics = [#tpu.dimension_semantics<parallel>], iteration_bounds = array<i64: 2>, scalar_prefetch = 0 : i64, scratch_operands = 0 : i64, tpu.core_type = #tpu.core_type<tc>, window_params = [{transform_indices = @transform_0, window_bounds = array<i64: 8, 128>}, {pipeline_mode = #tpu.pipeline_mode<synchronous>, transform_indices = @transform_1, window_bounds = array<i64: 128, 128>}, {pipeline_mode = #tpu.pipeline_mode<synchronous>, transform_indices = @transform_2, window_bounds = array<i64: 3, 128>}, {transform_indices = @transform_3, window_bounds = array<i64: 8, 128>}]} {
    %c0 = arith.constant 0 : index
    %c0_0 = arith.constant 0 : index
    %0 = vector.load %arg1[%c0, %c0_0] : memref<8x128xf32, #tpu.memory_space<vmem>>, vector<8x128xf32>
    %c0_1 = arith.constant 0 : index
    %c0_2 = arith.constant 0 : index
    %1 = vector.load %arg2[%c0_1, %c0_2] : memref<128x128xbf16, #tpu.memory_space<vmem>>, vector<128x128xbf16>
    %2 = arith.truncf %0 : vector<8x128xf32> to vector<8x128xbf16>
    %cst = arith.constant dense<0.000000e+00> : vector<8x128xf32>
    %3 = tpu.matmul %2, %1, %cst {dimension_numbers = #tpu.dot_dimension_numbers<[1], [0], [0], [1], [0, 0, 1, 1], [], []>} : vector<8x128xbf16>, vector<128x128xbf16>, vector<8x128xf32> -> vector<8x128xf32>
    %c0_3 = arith.constant 0 : index
    %c0_4 = arith.constant 0 : index
    %4 = vector.load %arg3[%c0_3, %c0_4] : memref<3x128xf32, #tpu.memory_space<vmem>>, vector<3x128xf32>
    %5 = vector.extract_strided_slice %4 {offsets = [0, 0], sizes = [1, 128], strides = [1, 1]} : vector<3x128xf32> to vector<1x128xf32>
    %6 = vector.broadcast %5 : vector<1x128xf32> to vector<8x128xf32>
    %7 = arith.addf %3, %6 : vector<8x128xf32>
    %cst_5 = arith.constant dense<0.000000e+00> : vector<8xf32>
    %8 = vector.multi_reduction <add>, %7, %cst_5 [1] : vector<8x128xf32> to vector<8xf32>
    %9 = vector.shape_cast %8 : vector<8xf32> to vector<8x1xf32>
    %cst_6 = arith.constant 1.280000e+02 : f32
    %10 = vector.broadcast %cst_6 : f32 to vector<8x1xf32>
    %11 = arith.divf %9, %10 : vector<8x1xf32>
    %12 = vector.broadcast %11 : vector<8x1xf32> to vector<8x128xf32>
    %13 = arith.subf %7, %12 : vector<8x128xf32>
    %14 = arith.mulf %13, %13 : vector<8x128xf32>
    %cst_7 = arith.constant dense<0.000000e+00> : vector<8xf32>
    %15 = vector.multi_reduction <add>, %14, %cst_7 [1] : vector<8x128xf32> to vector<8xf32>
    %16 = vector.shape_cast %15 : vector<8xf32> to vector<8x1xf32>
    %cst_8 = arith.constant 1.270000e+02 : f32
    %17 = vector.broadcast %cst_8 : f32 to vector<8x1xf32>
    %18 = arith.divf %16, %17 : vector<8x1xf32>
    %19 = math.sqrt %18 : vector<8x1xf32>
    %cst_9 = arith.constant 9.99999997E-7 : f32
    %20 = vector.broadcast %cst_9 : f32 to vector<8x1xf32>
    %21 = arith.addf %19, %20 : vector<8x1xf32>
    %22 = tpu.reciprocal %21 {approx = true} : vector<8x1xf32> -> vector<8x1xf32>
    %23 = arith.mulf %21, %22 : vector<8x1xf32>
    %cst_10 = arith.constant 2.000000e+00 : f32
    %24 = vector.broadcast %cst_10 : f32 to vector<8x1xf32>
    %25 = arith.subf %24, %23 : vector<8x1xf32>
    %26 = arith.mulf %22, %25 : vector<8x1xf32>
    %27 = vector.extract_strided_slice %4 {offsets = [1, 0], sizes = [1, 128], strides = [1, 1]} : vector<3x128xf32> to vector<1x128xf32>
    %28 = vector.broadcast %26 : vector<8x1xf32> to vector<8x128xf32>
    %29 = arith.mulf %13, %28 : vector<8x128xf32>
    %30 = vector.broadcast %27 : vector<1x128xf32> to vector<8x128xf32>
    %31 = arith.mulf %30, %29 : vector<8x128xf32>
    %32 = vector.extract_strided_slice %4 {offsets = [2, 0], sizes = [1, 128], strides = [1, 1]} : vector<3x128xf32> to vector<1x128xf32>
    %33 = vector.broadcast %32 : vector<1x128xf32> to vector<8x128xf32>
    %34 = arith.addf %31, %33 : vector<8x128xf32>
    %c0_11 = arith.constant 0 : index
    %c0_12 = arith.constant 0 : index
    %35 = vector.load %arg4[%c0_11, %c0_12] : memref<8x128xf32, #tpu.memory_space<vmem>>, vector<8x128xf32>
    tpu.vector_store %arg4[%c0_11, %c0_12], %34 {strides = array<i32>} : memref<8x128xf32, #tpu.memory_space<vmem>>, vector<8x128xf32>,
    return
  }
  func.func @transform_0(%arg0: i32) -> (i32, i32) {
    %c0_i32 = arith.constant 0 : i32
    %c0_i32_0 = arith.constant 0 : i32
    return %arg0, %c0_i32 : i32, i32
  }
  func.func @transform_1(%arg0: i32) -> (i32, i32) {
    %c0_i32 = arith.constant 0 : i32
    %c0_i32_0 = arith.constant 0 : i32
    %c0_i32_1 = arith.constant 0 : i32
    return %c0_i32, %c0_i32_0 : i32, i32
  }
  func.func @transform_2(%arg0: i32) -> (i32, i32) {
    %c0_i32 = arith.constant 0 : i32
    %c0_i32_0 = arith.constant 0 : i32
    %c0_i32_1 = arith.constant 0 : i32
    return %c0_i32, %c0_i32_0 : i32, i32
  }
  func.func @transform_3(%arg0: i32) -> (i32, i32) {
    %c0_i32 = arith.constant 0 : i32
    %c0_i32_0 = arith.constant 0 : i32
    return %arg0, %c0_i32 : i32, i32
  }
}

module attributes {stable_mosaic.version = 11 : i64} {
  func.func @_src_embed_kernel(%arg0: i32, %arg1: memref<8x128xf32, #tpu.memory_space<vmem>>, %arg2: memref<128x128xbf16, #tpu.memory_space<vmem>>, %arg3: memref<3x128xf32, #tpu.memory_space<vmem>>, %arg4: memref<8x128xf32, #tpu.memory_space<vmem>>) attributes {dimension_semantics = [#tpu.dimension_semantics<parallel>], iteration_bounds = array<i64: 2>, scalar_prefetch = 0 : i64, scratch_operands = 0 : i64, tpu.core_type = #tpu.core_type<tc>, window_params = [{transform_indices = @transform_0, window_bounds = array<i64: 8, 128>}, {pipeline_mode = #tpu.pipeline_mode<synchronous>, transform_indices = @transform_1, window_bounds = array<i64: 128, 128>}, {pipeline_mode = #tpu.pipeline_mode<synchronous>, transform_indices = @transform_2, window_bounds = array<i64: 3, 128>}, {transform_indices = @transform_3, window_bounds = array<i64: 8, 128>}]} {
    %c0 = arith.constant 0 : index
    %c0_0 = arith.constant 0 : index
    %0 = vector.load %arg1[%c0, %c0_0] : memref<8x128xf32, #tpu.memory_space<vmem>>, vector<8x128xf32>
    %c0_1 = arith.constant 0 : index
    %c0_2 = arith.constant 0 : index
    %1 = vector.load %arg2[%c0_1, %c0_2] : memref<128x128xbf16, #tpu.memory_space<vmem>>, vector<128x128xbf16>
    %2 = arith.truncf %0 : vector<8x128xf32> to vector<8x128xbf16>
    %cst = arith.constant dense<0.000000e+00> : vector<8x128xf32>
    %3 = tpu.matmul %2, %1, %cst {dimension_numbers = #tpu.dot_dimension_numbers<[1], [0], [0], [1], [0, 0, 1, 1], [], []>} : vector<8x128xbf16>, vector<128x128xbf16>, vector<8x128xf32> -> vector<8x128xf32>
    %c0_3 = arith.constant 0 : index
    %c0_4 = arith.constant 0 : index
    %4 = vector.load %arg3[%c0_3, %c0_4] : memref<3x128xf32, #tpu.memory_space<vmem>>, vector<3x128xf32>
    %5 = vector.extract_strided_slice %4 {offsets = [0, 0], sizes = [1, 128], strides = [1, 1]} : vector<3x128xf32> to vector<1x128xf32>
    %6 = vector.broadcast %5 : vector<1x128xf32> to vector<8x128xf32>
    %7 = arith.addf %3, %6 : vector<8x128xf32>
    %cst_5 = arith.constant dense<0.000000e+00> : vector<8xf32>
    %8 = vector.multi_reduction <add>, %7, %cst_5 [1] : vector<8x128xf32> to vector<8xf32>
    %9 = vector.shape_cast %8 : vector<8xf32> to vector<8x1xf32>
    %cst_6 = arith.constant 1.280000e+02 : f32
    %10 = vector.broadcast %cst_6 : f32 to vector<8x1xf32>
    %11 = arith.divf %9, %10 : vector<8x1xf32>
    %12 = vector.broadcast %11 : vector<8x1xf32> to vector<8x128xf32>
    %13 = arith.subf %7, %12 : vector<8x128xf32>
    %14 = arith.mulf %13, %13 : vector<8x128xf32>
    %cst_7 = arith.constant dense<0.000000e+00> : vector<8xf32>
    %15 = vector.multi_reduction <add>, %14, %cst_7 [1] : vector<8x128xf32> to vector<8xf32>
    %16 = vector.shape_cast %15 : vector<8xf32> to vector<8x1xf32>
    %cst_8 = arith.constant 1.270000e+02 : f32
    %17 = vector.broadcast %cst_8 : f32 to vector<8x1xf32>
    %18 = arith.divf %16, %17 : vector<8x1xf32>
    %19 = math.sqrt %18 : vector<8x1xf32>
    %cst_9 = arith.constant 9.99999997E-7 : f32
    %20 = vector.broadcast %cst_9 : f32 to vector<8x1xf32>
    %21 = arith.addf %19, %20 : vector<8x1xf32>
    %22 = tpu.reciprocal %21 {approx = true} : vector<8x1xf32> -> vector<8x1xf32>
    %23 = arith.mulf %21, %22 : vector<8x1xf32>
    %cst_10 = arith.constant 2.000000e+00 : f32
    %24 = vector.broadcast %cst_10 : f32 to vector<8x1xf32>
    %25 = arith.subf %24, %23 : vector<8x1xf32>
    %26 = arith.mulf %22, %25 : vector<8x1xf32>
    %27 = vector.extract_strided_slice %4 {offsets = [1, 0], sizes = [1, 128], strides = [1, 1]} : vector<3x128xf32> to vector<1x128xf32>
    %28 = vector.broadcast %26 : vector<8x1xf32> to vector<8x128xf32>
    %29 = arith.mulf %13, %28 : vector<8x128xf32>
    %30 = vector.broadcast %27 : vector<1x128xf32> to vector<8x128xf32>
    %31 = arith.mulf %30, %29 : vector<8x128xf32>
    %32 = vector.extract_strided_slice %4 {offsets = [2, 0], sizes = [1, 128], strides = [1, 1]} : vector<3x128xf32> to vector<1x128xf32>
    %33 = vector.broadcast %32 : vector<1x128xf32> to vector<8x128xf32>
    %34 = arith.addf %31, %33 : vector<8x128xf32>
    %c0_11 = arith.constant 0 : index
    %c0_12 = arith.constant 0 : index
    %35 = vector.load %arg4[%c0_11, %c0_12] : memref<8x128xf32, #tpu.memory_space<vmem>>, vector<8x128xf32>
    tpu.vector_store %arg4[%c0_11, %c0_12], %34 {strides = array<i32>} : memref<8x128xf32, #tpu.memory_space<vmem>>, vector<8x128xf32>,
    return
  }
  func.func @transform_0(%arg0: i32) -> (i32, i32) {
    %c0_i32 = arith.constant 0 : i32
    %c0_i32_0 = arith.constant 0 : i32
    return %arg0, %c0_i32 : i32, i32
  }
  func.func @transform_1(%arg0: i32) -> (i32, i32) {
    %c0_i32 = arith.constant 0 : i32
    %c0_i32_0 = arith.constant 0 : i32
    %c0_i32_1 = arith.constant 0 : i32
    return %c0_i32, %c0_i32_0 : i32, i32
  }
  func.func @transform_2(%arg0: i32) -> (i32, i32) {
    %c0_i32 = arith.constant 0 : i32
    %c0_i32_0 = arith.constant 0 : i32
    %c0_i32_1 = arith.constant 0 : i32
    return %c0_i32, %c0_i32_0 : i32, i32
  }
  func.func @transform_3(%arg0: i32) -> (i32, i32) {
    %c0_i32 = arith.constant 0 : i32
    %c0_i32_0 = arith.constant 0 : i32
    return %arg0, %c0_i32 : i32, i32
  }
}

</mosaic_0001>

<bundles_post_ra>
// kernel: tpu_custom_call.1
= control target key start
LH: loop header
LB: loop body
LE: loop exit
PB: predicated region body
PF: predicated region fallthrough
CT: control target
= control target key end

     0   :  { %8 = vsyncpa [#allocation3], 0  ;;  %s925_s0 = inlined_call_operand.hbm [shape: f32[16,128], index: 0, kind: input, shape index: {}]   ;;  %s926_s1 = inlined_call_operand.hbm [shape: bf16[128,128], index: 1, kind: input, shape index: {}]   ;;  %s927_s2 = inlined_call_operand.vmem [shape: f32[3,128], index: 2, kind: input, shape index: {}]   ;;  %s928_s3 = inlined_call_operand.hbm [shape: f32[16,128], index: 3, kind: output, shape index: {}]  }
   0x1   :  { %10 = vsyncpa [#allocation3 + $0x1], 0 }
   0x2   :  { %11 = vsyncpa [#allocation6], 0 }
   0x3   :  { %12 = vsyncpa [#allocation4], 0 }
   0x4   :  { %14 = vsyncpa [#allocation4 + $0x1], 0  ;;  %s722_s12 = smov 0   ;;  %s724_s13 = smov 0  }
   0x5   :  { %s726_s14 = smov 0   ;;  %s728_s15 = smov 0  }
   0x6 LB: > { %s743_s16 = sadd.s32 4294967295, %s693_s15   ;;  %s441_s17 = sadd.s32 4294967294, %s693_s15   ;;  %s693_s15 = sphi %s728_s15, %s948_s15   ;;  %s689_s14 = sphi %s726_s14, %s947_s14   ;;  %s685_s13 = sphi %s724_s13, %s946_s13   ;;  %s681_s12 = sphi %s722_s12, %s945_s12  }
   0x7   : > { %p40_p0 = scmp.ne.s32.totalorder %s685_s13, %s681_s12  ;;  %p929_p1 = scmp.eq.s32.totalorder %s743_s16, 0 }
   0x8   : > { %p112_p3 = scmp.eq.s32.totalorder %s441_s17, 1  ;;  %p442_p5 = scmp.ge.s32.totalorder %s693_s15, 1 }
   0x9   : > { %p752_p4 = por %p929_p1, %p40_p0  ;;  %p119_p7 = scmp.lt.s32.totalorder %s693_s15, 3 }
   0xa   : > { %p757_p6 = por %p112_p3, %p40_p0  ;;  %s695_s21 = smov [#allocation5]  }
   0xb   : > { %s932_s18 = scalar_select %p752_p4, 1, 0 }
   0xc   : > { %s933_s19 = scalar_select %p757_p6, 1, 0 }
   0xd   : > { %p762_p8 = pnand %p442_p5, %p119_p7  ;;  %s131_s22 = sshll.u32 %s695_s21, 4  ;;  %s766_s22 = int_to_ptr.vmem [resolvable:$true] %s131_s22 }
   0xe   : > { %s778_s24 = sadd.s32 1, %s693_s15   ;;  %s27_s25 = sadd.s32 1, %s689_s14 }
   0xf   : > { %s934_s20 = scalar_select %p762_p8, 1, 0 }
  0x10   : > { %p500_p9 = pneg %p762_p8  ;;  %s24_s26 = ssub.s32 %s693_s15, %s778_s24 }
  0x11   : > { %s565_s29 = scalar_lea.hbm %s926_s1, 1024 }
  0x12   : > { %p773_p11 = pnand %p500_p9, %p929_p1  ;;  %p566_p12 = scmp.ne.s32.totalorder %s926_s1, %s565_s29 }
  0x13   : > { %p572_p5 = scmp.lt.u32.totalorder %s565_s29, %s926_s1 }
  0x14   : > { %p567_p13 = pneg %p773_p11 }
  0x16   : > { %p568_p0 = pnand %p567_p13, %p566_p12 }
  0x18   : > { %p569_p3 = pneg %p568_p0 }
  0x1a   : > { %p574_p7 = pnand %p572_p5, %p569_p3 }
  0x1c   : > { %577 = shalt.err (!%p574_p7)
}
  0x1d   : > { %s578_s7 = scalar_lea.vmem %s766_s22, 1024  ;;  %p586_p2 = scmp.lt.s32.totalorder %s766_s22, %s766_s22 }
  0x1e   : > { %p579_p9 = scmp.ne.s32.totalorder %s766_s22, %s578_s7  ;;  %p587_p6 = scmp.lt.s32.totalorder %s578_s7, %s578_s7 }
  0x20   : > { %p581_p10 = pnand %p579_p9, %p567_p13  ;;  %p588_p4 = por %p587_p6, %p586_p2 }
  0x22   : > { %p582_p1 = pneg %p581_p10 }
  0x24   : > { %p589_p8 = pnand %p588_p4, %p582_p1 }
  0x26   : > { %592 = shalt.err (!%p589_p8)
}
  0x27   : > { %s696_s8 = smov 64   ;;  %s697_s9 = smov 4  }
  0x28   : > { %503 = dma.hbm_to_vmem [thread:$0]  (!%p773_p11), %s926_s1, 1024, %s766_s22, [#allocation6], %s696_s8, %s696_s8, %s697_s9  }
  0x29   : > { %p25_p2 = scmp.eq.s32.totalorder %s24_s26, 0  ;;  %p34_p1 = scmp.ne.s32.totalorder %s689_s14, %s685_s13 }
  0x2a   : > { %p35_p4 = scmp.eq.s32.totalorder %s693_s15, 0  ;;  %p513_p6 = scmp.lt.s32.totalorder %s693_s15, 2 }
  0x2b   : > { %s809_s17 = scalar_select %p25_p2, %s689_s14, %s27_s25  }
  0x2c   : > { %p36_p8 = por %p35_p4, %p34_p1  ;;  %p936_p10 = scmp.eq.s32.totalorder %s743_s16, 1 }
  0x2d   : > { %s148_s27 = sand.u32 1, %s689_s14   ;;  %s446_s28 = sshll.u32 %s693_s15, 7 }
  0x2e   : > { %p813_p12 = por %p936_p10, %p34_p1  ;;  %s445_s29 = sshll.u32 %s148_s27, 3 }
  0x2f   : > { %s822_s4 = scalar_lea.hbm %s925_s0, %s446_s28  ;;  %s152_s22 = scalar_lea.vmem [#allocation2], %s445_s29 }
  0x30   : > { %s159_s25 = sshll.u32 %s152_s22, 4  ;;  %p824_p11 = pnand %p513_p6, %p36_p8  ;;  %s828_s25 = int_to_ptr.vmem [resolvable:$true] %s159_s25 }
  0x31   : > { %s149_s5 = scalar_lea.sflag [#allocation3], %s148_s27  ;;  %s593_s6 = scalar_lea.hbm %s822_s4, 128 }
  0x32   : > { %p594_p13 = scmp.ne.s32.totalorder %s822_s4, %s593_s6  ;;  %p595_p0 = pneg %p824_p11 }
  0x33   : > { %s598_s9 = scalar_lea.hbm %s925_s0, 256  ;;  %p599_p7 = scmp.lt.u32.totalorder %s822_s4, %s925_s0 }
  0x34   : > { %p596_p3 = pnand %p595_p0, %p594_p13  ;;  %p600_p9 = scmp.lt.u32.totalorder %s598_s9, %s593_s6 }
  0x35   : > { %p602_p1 = scmp.lt.u32.totalorder %s593_s6, %s822_s4 }
  0x36   : > { %p597_p5 = pneg %p596_p3  ;;  %p601_p2 = por %p600_p9, %p599_p7 }
  0x38   : > { %p603_p4 = por %p602_p1, %p601_p2 }
  0x3a   : > { %p604_p6 = pnand %p603_p4, %p597_p5 }
  0x3c   : > { %607 = shalt.err (!%p604_p6)
}
  0x3d   : > { %s608_s27 = scalar_lea.vmem %s828_s25, 128  ;;  %s698_s28 = smov [#allocation2]  }
  0x3e   : > { %p609_p8 = scmp.ne.s32.totalorder %s828_s25, %s608_s27  ;;  %s613_s29 = sshll.u32 %s698_s28, 4  ;;  %s614_s29 = int_to_ptr.vmem [resolvable:$false] %s613_s29 }
  0x3f   : > { %s615_s23 = scalar_lea.vmem %s614_s29, 256  ;;  %p616_p3 = scmp.lt.s32.totalorder %s828_s25, %s614_s29 }
  0x40   : > { %p611_p10 = pnand %p609_p8, %p595_p0  ;;  %p617_p7 = scmp.lt.s32.totalorder %s615_s23, %s608_s27 }
  0x42   : > { %p612_p13 = pneg %p611_p10  ;;  %p618_p9 = por %p617_p7, %p616_p3 }
  0x44   : > { %p619_p2 = pnand %p618_p9, %p612_p13 }
  0x46   : > { %622 = shalt.err (!%p619_p2)
}
  0x47   : > { %507 = dma.hbm_to_vmem [thread:$0]  (!%p824_p11), %s822_s4, 128, %s828_s25, %s149_s5  }
  0x48   : > { %p939_p5 = scmp.ne.s32.totalorder %s934_s20, 0 }
  0x49   : > { %s858_s30 = sand.u32 (!%p939_p5), 1, %s685_s13   ;;  %p940_p0 = scmp.ne.s32.totalorder (!%p939_p5), %s932_s18, 0 }
  0x4a   : > { %168 = sbr.rel (%p939_p5) target bundleno = 678 (0x2a6), region = 32  ;;  %s448_s22 = sshll.u32 (!%p939_p5), %s858_s30, 3 }
  0x4b   : > { %s171_s6 = scalar_lea.sflag (!%p939_p5), [#allocation3], %s858_s30  ;;  %s174_s7 = scalar_lea.vmem (!%p939_p5), [#allocation2], %s448_s22 }
  0x51   : > { %668 = dma.done.wait (%p940_p0), %s171_s6, 128  }
  0x52   : > { %670 = vsyncadd (%p940_p0), %s171_s6, 4294967168  ;;  %p941_p11 = scmp.eq.s32.totalorder %s743_s16, 0 }
  0x54   : > { %672 = dma.done.wait (%p941_p11), [#allocation6], 1024   ;;  %p942_p1 = pmov %p941_p11 }
  0x55   : > { %v699_v0 = vmov 0.0   ;;  %vm700_vm0 = vmmov 0   ;;  %v553_v1 = vld [vmem:[#allocation5] sm:$0xff]   ;;  %v554_v2 = vld [vmem:[#allocation5 + $0x8] sm:$0xff]   ;;  %v555_v3 = vld [vmem:[#allocation5 + $0x10] sm:$0xff]   ;;  %v221_v11 = vlaneseq  ;;  %s460_s4 = sshll.u32 %s743_s16, 7 }
  0x56   : > { %674 = vsyncadd (%p942_p1), [#allocation6], 4294966272  ;;  %472 = vmatprep.subr.bf16.mxu0 %v699_v0  ;;  %488 = vmatprep.mubr.msk.bf16.mxu0 %vm700_vm0, %v699_v0  ;;  %v556_v4 = vld [vmem:[#allocation5 + $0x18] sm:$0xff]   ;;  %v557_v5 = vld [vmem:[#allocation5 + $0x20] sm:$0xff]   ;;  %s200_s25 = scalar_lea.vmem [#allocation7], %s448_s22  ;;  %s881_s9 = scalar_lea.hbm %s928_s3, %s460_s4 }
  0x57   : > { %473 = vmatpush3.bf16.msra.mxu0 %v553_v1  ;;  %v558_v6 = vld [vmem:[#allocation5 + $0x28] sm:$0xff]   ;;  %v559_v7 = vld [vmem:[#allocation5 + $0x30] sm:$0xff]   ;;  %v560_v8 = vld [vmem:[#allocation5 + $0x38] sm:$0xff]   ;;  %v222_v12 = vshrl.u32 %v221_v11, 7  ;;  %s361_s26 = sshll.u32 %s200_s25, 4  ;;  %s348_s10 = scalar_lea.sflag [#allocation4], %s858_s30  ;;  %s883_s26 = int_to_ptr.vmem [resolvable:$true] %s361_s26 }
  0x58   : > { %474 = vmatprep.subr.bf16.mxu0 %v699_v0  ;;  %v202_v9 = vld [vmem:[%s174_s7] sm:$0xff]  ;;  %s623_s11 = scalar_lea.vmem %s883_s26, 128  ;;  %s701_s16 = smov [#allocation7]  }
  0x59   : > { %v219_v10 = vpack.c.bf16 %v202_v9, %v202_v9  ;;  %v223_v13 = vsub.s32 0, %v222_v12  ;;  %v220_v14 = vld [vmem:[%s927_s2] sm:$0x7]  ;;  %v338_v34 = vsub.s32 1, %v222_v12  ;;  %v343_v36 = vsub.s32 2, %v222_v12  ;;  %p624_p4 = scmp.ne.s32.totalorder %s883_s26, %s623_s11  ;;  %s627_s27 = sshll.u32 %s701_s16, 4  ;;  %s628_s27 = int_to_ptr.vmem [resolvable:$false] %s627_s27 }
  0x5a   : > { %s629_s28 = scalar_lea.vmem %s628_s27, 256  ;;  %p630_p10 = scmp.lt.s32.totalorder %s883_s26, %s628_s27 }
  0x5b   : > { %475 = vmatpush3.bf16.msra.mxu0 %v554_v2  ;;  %v224_v15 = vrot.slane %v220_v14, %v223_v13  ;;  %v339_v38 = vrot.slane %v220_v14, %v338_v34  ;;  %v344_v40 = vrot.slane %v220_v14, %v343_v36  ;;  %p625_p6 = pnand %p624_p4, %p813_p12  ;;  %p631_p13 = scmp.lt.s32.totalorder %s629_s28, %s623_s11 }
  0x5c   : > { %476 = vmatprep.subr.bf16.mxu0 %v699_v0 }
  0x5d   : > { %p626_p8 = pneg %p625_p6  ;;  %p632_p3 = por %p631_p13, %p630_p10 }
  0x5f   : > { %477 = vmatpush3.bf16.msra.mxu0 %v555_v3  ;;  %p633_p7 = pnand %p632_p3, %p626_p8 }
  0x60   : > { %478 = vmatprep.subr.bf16.mxu0 %v699_v0 }
  0x63   : > { %479 = vmatpush3.bf16.msra.mxu0 %v556_v4 }
  0x64   : > { %480 = vmatprep.subr.bf16.mxu0 %v699_v0 }
  0x67   : > { %481 = vmatpush3.bf16.msra.mxu0 %v557_v5 }
  0x68   : > { %482 = vmatprep.subr.bf16.mxu0 %v699_v0 }
  0x6b   : > { %483 = vmatpush3.bf16.msra.mxu0 %v558_v6 }
  0x6c   : > { %484 = vmatprep.subr.bf16.mxu0 %v699_v0 }
  0x6f   : > { %485 = vmatpush3.bf16.msra.mxu0 %v559_v7 }
  0x70   : > { %486 = vmatprep.subr.bf16.mxu0 %v699_v0 }
  0x73   : > { %487 = vmatpush3.bf16.msra.mxu0 %v560_v8 }
  0x76   : > { %489 = vmatmul.mubr.bf16.vlgmr.msra.gmra.mrb[0].mxu0 %v219_v10 }
 0x149   : > { %v307_v16 = vpop.f32.mrb[0].mxu0 }
 0x14a   : > { %v308_v17 = vadd.f32 %v307_v16, %v224_v15  ;;  %v490_v18 = vpop.f32.mrb[1].mxu0 }
 0x14b   : > { %v310_v19 = vpop.f32.mrb[2].mxu0 }
 0x14c   : > { %313 = vadd.xlane.f32.xlu0 %v308_v17  ;;  %v491_v20 = vpop.f32.mrb[3].mxu0 }
 0x1d9   : > { %v314_v21 = vpop.xlane.xlu0 %313 }
 0x1da   : > { %v316_v22 = vmul.f32 0.0078125, %v314_v21 }
 0x1dc   : > { %v317_v23 = vsub.f32 %v308_v17, %v316_v22 }
 0x1de   : > { %v318_v24 = vmul.f32 %v317_v23, %v317_v23 }
 0x1e0   : > { %319 = vadd.xlane.f32.xlu0 %v318_v24 }
 0x26d   : > { %v320_v25 = vpop.xlane.xlu0 %319 }
 0x26e   : > { %v322_v26 = vmul.f32 0.007874016, %v320_v25 }
 0x270   : > { %561 = vrsqrt.f32 %v322_v26  ;;  %vm325_vm1 = vcmp.eq.f32.partialorder %v322_v26, inf  ;;  %v328_v29 = vand.u32 2147483648, %v322_v26  ;;  %vm327_vm2 = vcmp.eq.f32.partialorder %v322_v26, 0.0 }
 0x27a   : > { %v562_v27 = vpop.eup %561 }
 0x27b   : > { %v324_v28 = vmul.f32 %v562_v27, %v322_v26 }
 0x27d   : > { %v326_v30 = vsel %vm325_vm1, %v322_v26, %v324_v28 }
 0x27e   : > { %v329_v31 = vsel %vm327_vm2, %v328_v29, %v326_v30 }
 0x27f   : > { %v330_v32 = vadd.f32 1e-06, %v329_v31 }
 0x281   : > { %563 = vrcp.f32 %v330_v32 }
 0x28b   : > { %v564_v33 = vpop.eup %563 }
 0x28c   : > { %v332_v35 = vmul.f32 %v564_v33, %v330_v32 }
 0x28e   : > { %v333_v37 = vsub.f32 2.0, %v332_v35 }
 0x290   : > { %v334_v39 = vmul.f32 %v564_v33, %v333_v37 }
 0x292   : > { %v335_v41 = vmul.f32 %v334_v39, %v317_v23 }
 0x294   : > { %v340_v42 = vmul.f32 %v339_v38, %v335_v41 }
 0x296   : > { %v345_v43 = vadd.f32 %v344_v40, %v340_v42 }
 0x298   : > { %346 = vst [vmem:[%s200_s25] sm:$0xff] %v345_v43 }
 0x299   : > { %636 = shalt.err (!%p633_p7)
}
 0x29a   : > { %s637_s29 = scalar_lea.hbm %s881_s9, 128  ;;  %s641_s22 = scalar_lea.hbm %s928_s3, 256 }
 0x29b   : > { %p638_p9 = scmp.ne.s32.totalorder %s881_s9, %s637_s29  ;;  %p642_p0 = scmp.lt.u32.totalorder %s881_s9, %s928_s3 }
 0x29c   : > { %p643_p11 = scmp.lt.u32.totalorder %s641_s22, %s637_s29  ;;  %p645_p4 = scmp.lt.u32.totalorder %s637_s29, %s881_s9 }
 0x29d   : > { %p639_p2 = pnand %p638_p9, %p813_p12 }
 0x29e   : > { %p644_p1 = por %p643_p11, %p642_p0 }
 0x29f   : > { %p640_p5 = pneg %p639_p2 }
 0x2a0   : > { %p646_p6 = por %p645_p4, %p644_p1 }
 0x2a2   : > { %p647_p8 = pnand %p646_p6, %p640_p5 }
 0x2a4   : > { %650 = shalt.err (!%p647_p8)
}
 0x2a5   : > { %498 = dma.vmem_to_hbm [thread:$0]  (%p813_p12), %s883_s26, 128, %s881_s9, %s348_s10  }
 0x2a6 PF: > { %s373_s18 = sand.u32 1, %s681_s12   ;;  %p943_p10 = scmp.ne.s32.totalorder %s933_s19, 0 }
 0x2a7   : > { %p944_p13 = scmp.ge.s32.totalorder %s693_s15, 2  ;;  %s374_s20 = scalar_lea.sflag [#allocation4], %s373_s18 }
 0x2a9   : > { %p509_p3 = pnand %p944_p13, %p943_p10 }
 0x2ab   : > { %676 = dma.done.wait (!%p509_p3), %s374_s20, 128  }
 0x2ac   : > { %678 = vsyncadd (!%p509_p3), %s374_s20, 4294967168  ;;  %p17_p7 = scmp.ge.s32.totalorder %s778_s24, 4   ;;  %s945_s12 = smov %s685_s13 }
 0x2ad   : > { %s946_s13 = smov %s689_s14  ;;  %s947_s14 = smov %s809_s17 }
 0x2ae   : > { %s948_s15 = smov %s778_s24  ;;  %19 = sbr.rel (!%p17_p7) target bundleno = 6 (0x6), region = 81 }
 0x2b5   :  { %379 = vsyncpa [#allocation3], 1 }
 0x2b6   :  { %381 = vsyncpa [#allocation3 + $0x1], 1 }
 0x2b7   :  { %382 = vsyncpa [#allocation6], 1 }
 0x2b8   :  { %383 = vsyncpa [#allocation4], 1 }
 0x2b9   :  { %385 = vsyncpa [#allocation4 + $0x1], 1 }

// kernel: tpu_custom_call.1
= control target key start
LH: loop header
LB: loop body
LE: loop exit
PB: predicated region body
PF: predicated region fallthrough
CT: control target
= control target key end

     0   :  { %8 = vsyncpa [#allocation3], 0  ;;  %s925_s0 = inlined_call_operand.hbm [shape: f32[16,128], index: 0, kind: input, shape index: {}]   ;;  %s926_s1 = inlined_call_operand.hbm [shape: bf16[128,128], index: 1, kind: input, shape index: {}]   ;;  %s927_s2 = inlined_call_operand.vmem [shape: f32[3,128], index: 2, kind: input, shape index: {}]   ;;  %s928_s3 = inlined_call_operand.hbm [shape: f32[16,128], index: 3, kind: output, shape index: {}]  }
   0x1   :  { %10 = vsyncpa [#allocation3 + $0x1], 0 }
   0x2   :  { %11 = vsyncpa [#allocation6], 0 }
   0x3   :  { %12 = vsyncpa [#allocation4], 0 }
   0x4   :  { %14 = vsyncpa [#allocation4 + $0x1], 0  ;;  %s722_s12 = smov 0   ;;  %s724_s13 = smov 0  }
   0x5   :  { %s726_s14 = smov 0   ;;  %s728_s15 = smov 0  }
   0x6 LB: > { %s743_s16 = sadd.s32 4294967295, %s693_s15   ;;  %s441_s17 = sadd.s32 4294967294, %s693_s15   ;;  %s693_s15 = sphi %s728_s15, %s948_s15   ;;  %s689_s14 = sphi %s726_s14, %s947_s14   ;;  %s685_s13 = sphi %s724_s13, %s946_s13   ;;  %s681_s12 = sphi %s722_s12, %s945_s12  }
   0x7   : > { %p40_p0 = scmp.ne.s32.totalorder %s685_s13, %s681_s12  ;;  %p929_p1 = scmp.eq.s32.totalorder %s743_s16, 0 }
   0x8   : > { %p112_p3 = scmp.eq.s32.totalorder %s441_s17, 1  ;;  %p442_p5 = scmp.ge.s32.totalorder %s693_s15, 1 }
   0x9   : > { %p752_p4 = por %p929_p1, %p40_p0  ;;  %p119_p7 = scmp.lt.s32.totalorder %s693_s15, 3 }
   0xa   : > { %p757_p6 = por %p112_p3, %p40_p0  ;;  %s695_s21 = smov [#allocation5]  }
   0xb   : > { %s932_s18 = scalar_select %p752_p4, 1, 0 }
   0xc   : > { %s933_s19 = scalar_select %p757_p6, 1, 0 }
   0xd   : > { %p762_p8 = pnand %p442_p5, %p119_p7  ;;  %s131_s22 = sshll.u32 %s695_s21, 4  ;;  %s766_s22 = int_to_ptr.vmem [resolvable:$true] %s131_s22 }
   0xe   : > { %s778_s24 = sadd.s32 1, %s693_s15   ;;  %s27_s25 = sadd.s32 1, %s689_s14 }
   0xf   : > { %s934_s20 = scalar_select %p762_p8, 1, 0 }
  0x10   : > { %p500_p9 = pneg %p762_p8  ;;  %s24_s26 = ssub.s32 %s693_s15, %s778_s24 }
  0x11   : > { %s565_s29 = scalar_lea.hbm %s926_s1, 1024 }
  0x12   : > { %p773_p11 = pnand %p500_p9, %p929_p1  ;;  %p566_p12 = scmp.ne.s32.totalorder %s926_s1, %s565_s29 }
  0x13   : > { %p572_p5 = scmp.lt.u32.totalorder %s565_s29, %s926_s1 }
  0x14   : > { %p567_p13 = pneg %p773_p11 }
  0x16   : > { %p568_p0 = pnand %p567_p13, %p566_p12 }
  0x18   : > { %p569_p3 = pneg %p568_p0 }
  0x1a   : > { %p574_p7 = pnand %p572_p5, %p569_p3 }
  0x1c   : > { %577 = shalt.err (!%p574_p7)
}
  0x1d   : > { %s578_s7 = scalar_lea.vmem %s766_s22, 1024  ;;  %p586_p2 = scmp.lt.s32.totalorder %s766_s22, %s766_s22 }
  0x1e   : > { %p579_p9 = scmp.ne.s32.totalorder %s766_s22, %s578_s7  ;;  %p587_p6 = scmp.lt.s32.totalorder %s578_s7, %s578_s7 }
  0x20   : > { %p581_p10 = pnand %p579_p9, %p567_p13  ;;  %p588_p4 = por %p587_p6, %p586_p2 }
  0x22   : > { %p582_p1 = pneg %p581_p10 }
  0x24   : > { %p589_p8 = pnand %p588_p4, %p582_p1 }
  0x26   : > { %592 = shalt.err (!%p589_p8)
}
  0x27   : > { %s696_s8 = smov 64   ;;  %s697_s9 = smov 4  }
  0x28   : > { %503 = dma.hbm_to_vmem [thread:$0]  (!%p773_p11), %s926_s1, 1024, %s766_s22, [#allocation6], %s696_s8, %s696_s8, %s697_s9  }
  0x29   : > { %p25_p2 = scmp.eq.s32.totalorder %s24_s26, 0  ;;  %p34_p1 = scmp.ne.s32.totalorder %s689_s14, %s685_s13 }
  0x2a   : > { %p35_p4 = scmp.eq.s32.totalorder %s693_s15, 0  ;;  %p513_p6 = scmp.lt.s32.totalorder %s693_s15, 2 }
  0x2b   : > { %s809_s17 = scalar_select %p25_p2, %s689_s14, %s27_s25  }
  0x2c   : > { %p36_p8 = por %p35_p4, %p34_p1  ;;  %p936_p10 = scmp.eq.s32.totalorder %s743_s16, 1 }
  0x2d   : > { %s148_s27 = sand.u32 1, %s689_s14   ;;  %s446_s28 = sshll.u32 %s693_s15, 7 }
  0x2e   : > { %p813_p12 = por %p936_p10, %p34_p1  ;;  %s445_s29 = sshll.u32 %s148_s27, 3 }
  0x2f   : > { %s822_s4 = scalar_lea.hbm %s925_s0, %s446_s28  ;;  %s152_s22 = scalar_lea.vmem [#allocation2], %s445_s29 }
  0x30   : > { %s159_s25 = sshll.u32 %s152_s22, 4  ;;  %p824_p11 = pnand %p513_p6, %p36_p8  ;;  %s828_s25 = int_to_ptr.vmem [resolvable:$true] %s159_s25 }
  0x31   : > { %s149_s5 = scalar_lea.sflag [#allocation3], %s148_s27  ;;  %s593_s6 = scalar_lea.hbm %s822_s4, 128 }
  0x32   : > { %p594_p13 = scmp.ne.s32.totalorder %s822_s4, %s593_s6  ;;  %p595_p0 = pneg %p824_p11 }
  0x33   : > { %s598_s9 = scalar_lea.hbm %s925_s0, 256  ;;  %p599_p7 = scmp.lt.u32.totalorder %s822_s4, %s925_s0 }
  0x34   : > { %p596_p3 = pnand %p595_p0, %p594_p13  ;;  %p600_p9 = scmp.lt.u32.totalorder %s598_s9, %s593_s6 }
  0x35   : > { %p602_p1 = scmp.lt.u32.totalorder %s593_s6, %s822_s4 }
  0x36   : > { %p597_p5 = pneg %p596_p3  ;;  %p601_p2 = por %p600_p9, %p599_p7 }
  0x38   : > { %p603_p4 = por %p602_p1, %p601_p2 }
  0x3a   : > { %p604_p6 = pnand %p603_p4, %p597_p5 }
  0x3c   : > { %607 = shalt.err (!%p604_p6)
}
  0x3d   : > { %s608_s27 = scalar_lea.vmem %s828_s25, 128  ;;  %s698_s28 = smov [#allocation2]  }
  0x3e   : > { %p609_p8 = scmp.ne.s32.totalorder %s828_s25, %s608_s27  ;;  %s613_s29 = sshll.u32 %s698_s28, 4  ;;  %s614_s29 = int_to_ptr.vmem [resolvable:$false] %s613_s29 }
  0x3f   : > { %s615_s23 = scalar_lea.vmem %s614_s29, 256  ;;  %p616_p3 = scmp.lt.s32.totalorder %s828_s25, %s614_s29 }
  0x40   : > { %p611_p10 = pnand %p609_p8, %p595_p0  ;;  %p617_p7 = scmp.lt.s32.totalorder %s615_s23, %s608_s27 }
  0x42   : > { %p612_p13 = pneg %p611_p10  ;;  %p618_p9 = por %p617_p7, %p616_p3 }
  0x44   : > { %p619_p2 = pnand %p618_p9, %p612_p13 }
  0x46   : > { %622 = shalt.err (!%p619_p2)
}
  0x47   : > { %507 = dma.hbm_to_vmem [thread:$0]  (!%p824_p11), %s822_s4, 128, %s828_s25, %s149_s5  }
  0x48   : > { %p939_p5 = scmp.ne.s32.totalorder %s934_s20, 0 }
  0x49   : > { %s858_s30 = sand.u32 (!%p939_p5), 1, %s685_s13   ;;  %p940_p0 = scmp.ne.s32.totalorder (!%p939_p5), %s932_s18, 0 }
  0x4a   : > { %168 = sbr.rel (%p939_p5) target bundleno = 678 (0x2a6), region = 32  ;;  %s448_s22 = sshll.u32 (!%p939_p5), %s858_s30, 3 }
  0x4b   : > { %s171_s6 = scalar_lea.sflag (!%p939_p5), [#allocation3], %s858_s30  ;;  %s174_s7 = scalar_lea.vmem (!%p939_p5), [#allocation2], %s448_s22 }
  0x51   : > { %668 = dma.done.wait (%p940_p0), %s171_s6, 128  }
  0x52   : > { %670 = vsyncadd (%p940_p0), %s171_s6, 4294967168  ;;  %p941_p11 = scmp.eq.s32.totalorder %s743_s16, 0 }
  0x54   : > { %672 = dma.done.wait (%p941_p11), [#allocation6], 1024   ;;  %p942_p1 = pmov %p941_p11 }
  0x55   : > { %v699_v0 = vmov 0.0   ;;  %vm700_vm0 = vmmov 0   ;;  %v553_v1 = vld [vmem:[#allocation5] sm:$0xff]   ;;  %v554_v2 = vld [vmem:[#allocation5 + $0x8] sm:$0xff]   ;;  %v555_v3 = vld [vmem:[#allocation5 + $0x10] sm:$0xff]   ;;  %v221_v11 = vlaneseq  ;;  %s460_s4 = sshll.u32 %s743_s16, 7 }
  0x56   : > { %674 = vsyncadd (%p942_p1), [#allocation6], 4294966272  ;;  %472 = vmatprep.subr.bf16.mxu0 %v699_v0  ;;  %488 = vmatprep.mubr.msk.bf16.mxu0 %vm700_vm0, %v699_v0  ;;  %v556_v4 = vld [vmem:[#allocation5 + $0x18] sm:$0xff]   ;;  %v557_v5 = vld [vmem:[#allocation5 + $0x20] sm:$0xff]   ;;  %s200_s25 = scalar_lea.vmem [#allocation7], %s448_s22  ;;  %s881_s9 = scalar_lea.hbm %s928_s3, %s460_s4 }
  0x57   : > { %473 = vmatpush3.bf16.msra.mxu0 %v553_v1  ;;  %v558_v6 = vld [vmem:[#allocation5 + $0x28] sm:$0xff]   ;;  %v559_v7 = vld [vmem:[#allocation5 + $0x30] sm:$0xff]   ;;  %v560_v8 = vld [vmem:[#allocation5 + $0x38] sm:$0xff]   ;;  %v222_v12 = vshrl.u32 %v221_v11, 7  ;;  %s361_s26 = sshll.u32 %s200_s25, 4  ;;  %s348_s10 = scalar_lea.sflag [#allocation4], %s858_s30  ;;  %s883_s26 = int_to_ptr.vmem [resolvable:$true] %s361_s26 }
  0x58   : > { %474 = vmatprep.subr.bf16.mxu0 %v699_v0  ;;  %v202_v9 = vld [vmem:[%s174_s7] sm:$0xff]  ;;  %s623_s11 = scalar_lea.vmem %s883_s26, 128  ;;  %s701_s16 = smov [#allocation7]  }
  0x59   : > { %v219_v10 = vpack.c.bf16 %v202_v9, %v202_v9  ;;  %v223_v13 = vsub.s32 0, %v222_v12  ;;  %v220_v14 = vld [vmem:[%s927_s2] sm:$0x7]  ;;  %v338_v34 = vsub.s32 1, %v222_v12  ;;  %v343_v36 = vsub.s32 2, %v222_v12  ;;  %p624_p4 = scmp.ne.s32.totalorder %s883_s26, %s623_s11  ;;  %s627_s27 = sshll.u32 %s701_s16, 4  ;;  %s628_s27 = int_to_ptr.vmem [resolvable:$false] %s627_s27 }
  0x5a   : > { %s629_s28 = scalar_lea.vmem %s628_s27, 256  ;;  %p630_p10 = scmp.lt.s32.totalorder %s883_s26, %s628_s27 }
  0x5b   : > { %475 = vmatpush3.bf16.msra.mxu0 %v554_v2  ;;  %v224_v15 = vrot.slane %v220_v14, %v223_v13  ;;  %v339_v38 = vrot.slane %v220_v14, %v338_v34  ;;  %v344_v40 = vrot.slane %v220_v14, %v343_v36  ;;  %p625_p6 = pnand %p624_p4, %p813_p12  ;;  %p631_p13 = scmp.lt.s32.totalorder %s629_s28, %s623_s11 }
  0x5c   : > { %476 = vmatprep.subr.bf16.mxu0 %v699_v0 }
  0x5d   : > { %p626_p8 = pneg %p625_p6  ;;  %p632_p3 = por %p631_p13, %p630_p10 }
  0x5f   : > { %477 = vmatpush3.bf16.msra.mxu0 %v555_v3  ;;  %p633_p7 = pnand %p632_p3, %p626_p8 }
  0x60   : > { %478 = vmatprep.subr.bf16.mxu0 %v699_v0 }
  0x63   : > { %479 = vmatpush3.bf16.msra.mxu0 %v556_v4 }
  0x64   : > { %480 = vmatprep.subr.bf16.mxu0 %v699_v0 }
  0x67   : > { %481 = vmatpush3.bf16.msra.mxu0 %v557_v5 }
  0x68   : > { %482 = vmatprep.subr.bf16.mxu0 %v699_v0 }
  0x6b   : > { %483 = vmatpush3.bf16.msra.mxu0 %v558_v6 }
  0x6c   : > { %484 = vmatprep.subr.bf16.mxu0 %v699_v0 }
  0x6f   : > { %485 = vmatpush3.bf16.msra.mxu0 %v559_v7 }
  0x70   : > { %486 = vmatprep.subr.bf16.mxu0 %v699_v0 }
  0x73   : > { %487 = vmatpush3.bf16.msra.mxu0 %v560_v8 }
  0x76   : > { %489 = vmatmul.mubr.bf16.vlgmr.msra.gmra.mrb[0].mxu0 %v219_v10 }
 0x149   : > { %v307_v16 = vpop.f32.mrb[0].mxu0 }
 0x14a   : > { %v308_v17 = vadd.f32 %v307_v16, %v224_v15  ;;  %v490_v18 = vpop.f32.mrb[1].mxu0 }
 0x14b   : > { %v310_v19 = vpop.f32.mrb[2].mxu0 }
 0x14c   : > { %313 = vadd.xlane.f32.xlu0 %v308_v17  ;;  %v491_v20 = vpop.f32.mrb[3].mxu0 }
 0x1d9   : > { %v314_v21 = vpop.xlane.xlu0 %313 }
 0x1da   : > { %v316_v22 = vmul.f32 0.0078125, %v314_v21 }
 0x1dc   : > { %v317_v23 = vsub.f32 %v308_v17, %v316_v22 }
 0x1de   : > { %v318_v24 = vmul.f32 %v317_v23, %v317_v23 }
 0x1e0   : > { %319 = vadd.xlane.f32.xlu0 %v318_v24 }
 0x26d   : > { %v320_v25 = vpop.xlane.xlu0 %319 }
 0x26e   : > { %v322_v26 = vmul.f32 0.007874016, %v320_v25 }
 0x270   : > { %561 = vrsqrt.f32 %v322_v26  ;;  %vm325_vm1 = vcmp.eq.f32.partialorder %v322_v26, inf  ;;  %v328_v29 = vand.u32 2147483648, %v322_v26  ;;  %vm327_vm2 = vcmp.eq.f32.partialorder %v322_v26, 0.0 }
 0x27a   : > { %v562_v27 = vpop.eup %561 }
 0x27b   : > { %v324_v28 = vmul.f32 %v562_v27, %v322_v26 }
 0x27d   : > { %v326_v30 = vsel %vm325_vm1, %v322_v26, %v324_v28 }
 0x27e   : > { %v329_v31 = vsel %vm327_vm2, %v328_v29, %v326_v30 }
 0x27f   : > { %v330_v32 = vadd.f32 1e-06, %v329_v31 }
 0x281   : > { %563 = vrcp.f32 %v330_v32 }
 0x28b   : > { %v564_v33 = vpop.eup %563 }
 0x28c   : > { %v332_v35 = vmul.f32 %v564_v33, %v330_v32 }
 0x28e   : > { %v333_v37 = vsub.f32 2.0, %v332_v35 }
 0x290   : > { %v334_v39 = vmul.f32 %v564_v33, %v333_v37 }
 0x292   : > { %v335_v41 = vmul.f32 %v334_v39, %v317_v23 }
 0x294   : > { %v340_v42 = vmul.f32 %v339_v38, %v335_v41 }
 0x296   : > { %v345_v43 = vadd.f32 %v344_v40, %v340_v42 }
 0x298   : > { %346 = vst [vmem:[%s200_s25] sm:$0xff] %v345_v43 }
 0x299   : > { %636 = shalt.err (!%p633_p7)
}
 0x29a   : > { %s637_s29 = scalar_lea.hbm %s881_s9, 128  ;;  %s641_s22 = scalar_lea.hbm %s928_s3, 256 }
 0x29b   : > { %p638_p9 = scmp.ne.s32.totalorder %s881_s9, %s637_s29  ;;  %p642_p0 = scmp.lt.u32.totalorder %s881_s9, %s928_s3 }
 0x29c   : > { %p643_p11 = scmp.lt.u32.totalorder %s641_s22, %s637_s29  ;;  %p645_p4 = scmp.lt.u32.totalorder %s637_s29, %s881_s9 }
 0x29d   : > { %p639_p2 = pnand %p638_p9, %p813_p12 }
 0x29e   : > { %p644_p1 = por %p643_p11, %p642_p0 }
 0x29f   : > { %p640_p5 = pneg %p639_p2 }
 0x2a0   : > { %p646_p6 = por %p645_p4, %p644_p1 }
 0x2a2   : > { %p647_p8 = pnand %p646_p6, %p640_p5 }
 0x2a4   : > { %650 = shalt.err (!%p647_p8)
}
 0x2a5   : > { %498 = dma.vmem_to_hbm [thread:$0]  (%p813_p12), %s883_s26, 128, %s881_s9, %s348_s10  }
 0x2a6 PF: > { %s373_s18 = sand.u32 1, %s681_s12   ;;  %p943_p10 = scmp.ne.s32.totalorder %s933_s19, 0 }
 0x2a7   : > { %p944_p13 = scmp.ge.s32.totalorder %s693_s15, 2  ;;  %s374_s20 = scalar_lea.sflag [#allocation4], %s373_s18 }
 0x2a9   : > { %p509_p3 = pnand %p944_p13, %p943_p10 }
 0x2ab   : > { %676 = dma.done.wait (!%p509_p3), %s374_s20, 128  }
 0x2ac   : > { %678 = vsyncadd (!%p509_p3), %s374_s20, 4294967168  ;;  %p17_p7 = scmp.ge.s32.totalorder %s778_s24, 4   ;;  %s945_s12 = smov %s685_s13 }
 0x2ad   : > { %s946_s13 = smov %s689_s14  ;;  %s947_s14 = smov %s809_s17 }
 0x2ae   : > { %s948_s15 = smov %s778_s24  ;;  %19 = sbr.rel (!%p17_p7) target bundleno = 6 (0x6), region = 81 }
 0x2b5   :  { %379 = vsyncpa [#allocation3], 1 }
 0x2b6   :  { %381 = vsyncpa [#allocation3 + $0x1], 1 }
 0x2b7   :  { %382 = vsyncpa [#allocation6], 1 }
 0x2b8   :  { %383 = vsyncpa [#allocation4], 1 }
 0x2b9   :  { %385 = vsyncpa [#allocation4 + $0x1], 1 }

</bundles_post_ra>
